<compile_context>
chip_gen: v5e
topology: v5e:2x2
jax: 0.10.0
libtpu: 0.0.40
codegen_flags: <defaults>
</compile_context>

<pallas_src>
import jax
import jax.numpy as jnp
from jax.experimental import pallas as pl
from jax.experimental.pallas import tpu as pltpu  # noqa: F401  (TPU backend)

HIDDEN = 64        # fixed by nn.Linear(len(domains), 64)
OUT_LANES = 128    # lane-dense packed output row
SLAB_ROWS = 16     # parameter slab padded to a clean (16, 128) tile
SLAB_LANES = 128


def _ethics_kernel(x_ref, domw_ref, p_ref, out_ref):
    D = domw_ref.shape[0]

    # ---- Fused domain evaluations: val_d = sum(W_d * gpt_output) ------------
    x = x_ref[...]                                      # (1, N)
    dw = domw_ref[...]                                  # (D, N)
    vals = jnp.sum(dw * x, axis=1, keepdims=True)       # (D, 1) per-domain values
    total = jnp.sum(vals)                               # overall_ethic_value

    # ---- Aggregator MLP (VPU/XLU only; MXU deliberately unused at M=1) ------
    w1 = p_ref[pl.ds(0, D), pl.ds(0, HIDDEN)]           # (D, H)  (transposed vs torch)
    b1 = p_ref[pl.ds(D, 1), pl.ds(0, HIDDEN)]           # (1, H)
    w2 = p_ref[pl.ds(D + 1, 1), pl.ds(0, HIDDEN)]       # (1, H)  (PyTorch row layout)
    b2 = p_ref[pl.ds(D + 2, 1), pl.ds(0, 1)]            # (1, 1)

    h = jnp.sum(w1 * vals, axis=0, keepdims=True) + b1  # Linear(D, H): sublane reduce
    h = jnp.maximum(h, 0.0)                             # ReLU
    score = jnp.sum(h * w2, axis=1, keepdims=True) + b2  # Linear(H, 1): lane reduce

    # ---- Pack everything into one lane-dense (1, 128) row -------------------
    # lanes 0..D-1 = domain values (vectorized scatter via a tiny one-hot),
    # lane D = sum, lane D+1 = aggregator score.  Single unmasked store.
    sub = jax.lax.broadcasted_iota(jnp.int32, (D, OUT_LANES), 0)
    lane = jax.lax.broadcasted_iota(jnp.int32, (D, OUT_LANES), 1)
    onehot = (sub == lane).astype(jnp.float32)                     # (D, 128)
    packed = jnp.sum(vals * onehot, axis=0, keepdims=True)         # (1, 128)
    lane_row = jax.lax.broadcasted_iota(jnp.int32, (1, OUT_LANES), 1)
    packed = packed + jnp.where(lane_row == D, total, 0.0)
    packed = packed + jnp.where(lane_row == D + 1, score, 0.0)
    out_ref[...] = packed


def ethics_forward(x_flat, dom_w, params_slab):
    """x_flat: (1, N) f32, dom_w: (D, N) f32, params_slab: (16, 128) f32.
    Returns a (1, 128) f32 row: [val_0..val_{D-1}, sum, score, 0, ...]."""
    D, N = dom_w.shape
    assert x_flat.shape == (1, N)
    assert D + 2 <= OUT_LANES and D + 3 <= SLAB_ROWS
    full = lambda shape: pl.BlockSpec(shape, lambda: tuple(0 for _ in shape))
    return pl.pallas_call(
        _ethics_kernel,
        out_shape=jax.ShapeDtypeStruct((1, OUT_LANES), jnp.float32),
        grid=(),  # single invocation; nothing to pipeline (few KiB of VMEM)
        in_specs=[
            full((1, N)),                   # flattened gpt_output
            full((D, N)),                   # all domain weights, one DMA
            full((SLAB_ROWS, SLAB_LANES)),  # all aggregator params, one DMA
        ],
        out_specs=full((1, OUT_LANES)),
    )(x_flat, dom_w, params_slab)


class EthicsModuleJAX:
    """JAX/Pallas port of EthicsModule.

    `domains` is a list of (name, weight) pairs; a domain's ethic value is the
    linear functional sum(weight * gpt_output), which lets the domain
    evaluations fuse into the kernel.
    """
    # TODO(synk): the original domain.evaluate() is arbitrary external Python;
    # only linear-functional domains can be fused into the Pallas kernel.

    def __init__(self, domains, key):
        self.domain_names = [name for name, _ in domains]
        D = self.D = len(domains)
        assert D + 3 <= SLAB_ROWS and D + 2 <= OUT_LANES

        k1, k2, k3, k4 = jax.random.split(key, 4)
        # PyTorch nn.Linear default init: U(-1/sqrt(fan_in), 1/sqrt(fan_in)).
        lim1 = 1.0 / (D ** 0.5)
        lim2 = 1.0 / (HIDDEN ** 0.5)
        # w1 stored transposed vs. PyTorch: (D, H) so h = vals^T @ w1 + b1.
        self.w1 = jax.random.uniform(k1, (D, HIDDEN), jnp.float32, -lim1, lim1)
        self.b1 = jax.random.uniform(k2, (1, HIDDEN), jnp.float32, -lim1, lim1)
        self.w2 = jax.random.uniform(k3, (1, HIDDEN), jnp.float32, -lim2, lim2)
        self.b2 = jax.random.uniform(k4, (1, 1), jnp.float32, -lim2, lim2)

        # Single parameter slab: rows 0..D-1 = w1, D = b1, D+1 = w2, D+2 = b2@lane0.
        slab = jnp.zeros((SLAB_ROWS, SLAB_LANES), jnp.float32)
        slab = slab.at[0:D, 0:HIDDEN].set(self.w1)
        slab = slab.at[D, 0:HIDDEN].set(self.b1[0])
        slab = slab.at[D + 1, 0:HIDDEN].set(self.w2[0])
        slab = slab.at[D + 2, 0].set(self.b2[0, 0])
        self.params_slab = slab

        # Domain weights flattened to (D, N); device-resident, uploaded once.
        self.dom_w = jnp.stack(
            [jnp.asarray(w, jnp.float32).reshape(-1) for _, w in domains])

        dom_w, params_slab = self.dom_w, self.params_slab

        def _fused(gpt_output):
            # One cheap XLA reshape (layout-only) then a single Pallas call.
            x_flat = jnp.asarray(gpt_output, jnp.float32).reshape(1, -1)
            return ethics_forward(x_flat, dom_w, params_slab)

        self._fused = jax.jit(_fused)

    def forward(self, gpt_output, original_input):
        packed = jax.device_get(self._fused(gpt_output))[0]  # single D2H sync
        D = self.D
        domain_ethic_values = [float(v) for v in packed[:D]]
        overall_ethic_value = float(packed[D])
        # Aggregator output is computed but (like the PyTorch original) is not
        # part of the returned tuple.
        _overall_score = float(packed[D + 1])
        decision = 'GO' if overall_ethic_value > 0 else 'NO GO'
        summary_reason = self.generate_summary(domain_ethic_values, decision)
        return (domain_ethic_values, overall_ethic_value, decision, summary_reason)

    def generate_summary(self, domain_ethic_values, decision):
        # TODO(synk): Translations.translate is external i18n glue; plain
        # f-strings are used instead.
        key_points = []
        for i, value in enumerate(domain_ethic_values):
            name = self.domain_names[i]
            if value < 0:
                key_points.append(
                    f"Domain {i + 1} ({name}) has supportive value of {value}")
            else:
                key_points.append(
                    f"Domain {i + 1} ({name}) has critical value of {value}")
        return f'\nDecision: {decision}.\n' + '\n'.join(key_points)


if __name__ == "__main__":
    key = jax.random.PRNGKey(0)
    k_params, k_in, k_dom = jax.random.split(key, 3)

    # Small deterministic inputs: gpt_output is an (8, 32) activation tensor.
    R, C = 8, 32
    gpt_output = jax.random.normal(k_in, (R, C), jnp.float32)
    original_input = "example prompt"  # unused by forward; kept for parity

    # 8 synthetic domains: deterministic linear functionals of gpt_output.
    D = 8
    dom_keys = jax.random.split(k_dom, D)
    domains = [
        (f"domain_{i}",
         0.05 * jax.random.normal(dom_keys[i], (R, C), jnp.float32))
        for i in range(D)
    ]
    module = EthicsModuleJAX(domains, k_params)

    # --- End-to-end fused forward (domain evals + aggregator in ONE kernel). -
    domain_vals, overall_val, decision, summary = module.forward(
        gpt_output, original_input)

    # --- Check the packed kernel output against a pure-JAX reference. --------
    packed = jax.block_until_ready(module._fused(gpt_output))
    packed = jax.device_get(packed)[0]

    ref_vals = jnp.array(
        [float(jnp.sum(w * gpt_output)) for _, w in domains], jnp.float32)
    ref_h = jnp.maximum(ref_vals[None, :] @ module.w1 + module.b1, 0.0)
    ref_score = float((ref_h @ module.w2.T + module.b2)[0, 0])
    ref_total = float(jnp.sum(ref_vals))

    for i in range(D):
        assert abs(domain_vals[i] - float(ref_vals[i])) < 1e-3
        assert abs(float(packed[i]) - float(ref_vals[i])) < 1e-3
    assert abs(overall_val - ref_total) < 1e-3
    assert abs(float(packed[D + 1]) - ref_score) < 1e-3
    assert abs(overall_val - sum(domain_vals)) < 1e-3
    assert decision in ("GO", "NO GO")
    assert isinstance(summary, str) and "Decision" in summary

    print("KERNEL_OK")
</pallas_src>

<mosaic_0001>
module attributes {stable_mosaic.version = 11 : i64} {
  func.func @_ethics_kernel(%arg0: memref<1x256xf32, #tpu.memory_space<vmem>>, %arg1: memref<8x256xf32, #tpu.memory_space<vmem>>, %arg2: memref<16x128xf32, #tpu.memory_space<vmem>>, %arg3: memref<1x128xf32, #tpu.memory_space<vmem>>) attributes {dimension_semantics = [], scalar_prefetch = 0 : i64, scratch_operands = 0 : i64, tpu.core_type = #tpu.core_type<tc>} {
    %c0 = arith.constant 0 : index
    %c0_0 = arith.constant 0 : index
    %0 = vector.load %arg0[%c0, %c0_0] : memref<1x256xf32, #tpu.memory_space<vmem>>, vector<1x256xf32>
    %c0_1 = arith.constant 0 : index
    %c0_2 = arith.constant 0 : index
    %1 = vector.load %arg1[%c0_1, %c0_2] : memref<8x256xf32, #tpu.memory_space<vmem>>, vector<8x256xf32>
    %2 = vector.broadcast %0 : vector<1x256xf32> to vector<8x256xf32>
    %3 = arith.mulf %1, %2 : vector<8x256xf32>
    %cst = arith.constant dense<0.000000e+00> : vector<8xf32>
    %4 = vector.multi_reduction <add>, %3, %cst [1] : vector<8x256xf32> to vector<8xf32>
    %5 = vector.shape_cast %4 : vector<8xf32> to vector<8x1xf32>
    %6 = vector.shape_cast %5 : vector<8x1xf32> to vector<1x8x1xf32>
    %cst_3 = arith.constant dense<0.000000e+00> : vector<1xf32>
    %7 = vector.multi_reduction <add>, %6, %cst_3 [1, 2] : vector<1x8x1xf32> to vector<1xf32>
    %8 = vector.shape_cast %7 : vector<1xf32> to vector<1x1x1xf32>
    %9 = vector.extract %8[0, 0, 0] : f32 from vector<1x1x1xf32>
    %c0_4 = arith.constant 0 : index
    %c0_5 = arith.constant 0 : index
    %10 = vector.load %arg2[%c0_4, %c0_5] : memref<16x128xf32, #tpu.memory_space<vmem>>, vector<8x64xf32>
    %c8 = arith.constant 8 : index
    %c0_6 = arith.constant 0 : index
    %11 = vector.load %arg2[%c8, %c0_6] : memref<16x128xf32, #tpu.memory_space<vmem>>, vector<1x64xf32>
    %c9 = arith.constant 9 : index
    %c0_7 = arith.constant 0 : index
    %12 = vector.load %arg2[%c9, %c0_7] : memref<16x128xf32, #tpu.memory_space<vmem>>, vector<1x64xf32>
    %c10 = arith.constant 10 : index
    %c0_8 = arith.constant 0 : index
    %13 = vector.load %arg2[%c10, %c0_8] : memref<16x128xf32, #tpu.memory_space<vmem>>, vector<1x1xf32>
    %14 = vector.broadcast %5 : vector<8x1xf32> to vector<8x64xf32>
    %15 = arith.mulf %10, %14 : vector<8x64xf32>
    %cst_9 = arith.constant dense<0.000000e+00> : vector<64xf32>
    %16 = vector.multi_reduction <add>, %15, %cst_9 [0] : vector<8x64xf32> to vector<64xf32>
    %17 = vector.shape_cast %16 : vector<64xf32> to vector<1x64xf32>
    %18 = arith.addf %17, %11 : vector<1x64xf32>
    %cst_10 = arith.constant 0.000000e+00 : f32
    %19 = vector.broadcast %cst_10 : f32 to vector<1x64xf32>
    %20 = arith.maximumf %18, %19 : vector<1x64xf32>
    %21 = arith.mulf %20, %12 : vector<1x64xf32>
    %cst_11 = arith.constant dense<0.000000e+00> : vector<1xf32>
    %22 = vector.multi_reduction <add>, %21, %cst_11 [1] : vector<1x64xf32> to vector<1xf32>
    %23 = vector.shape_cast %22 : vector<1xf32> to vector<1x1xf32>
    %24 = arith.addf %23, %13 : vector<1x1xf32>
    %25 = tpu.iota {dimensions = array<i32: 0>} : vector<8x128xi32>
    %26 = tpu.iota {dimensions = array<i32: 1>} : vector<8x128xi32>
    %27 = arith.cmpi eq, %25, %26 : vector<8x128xi32>
    %28 = arith.extui %27 : vector<8x128xi1> to vector<8x128xi32>
    %29 = arith.sitofp %28 : vector<8x128xi32> to vector<8x128xf32>
    %30 = vector.broadcast %5 : vector<8x1xf32> to vector<8x128xf32>
    %31 = arith.mulf %30, %29 : vector<8x128xf32>
    %cst_12 = arith.constant dense<0.000000e+00> : vector<128xf32>
    %32 = vector.multi_reduction <add>, %31, %cst_12 [0] : vector<8x128xf32> to vector<128xf32>
    %33 = vector.shape_cast %32 : vector<128xf32> to vector<1x128xf32>
    %34 = tpu.iota {dimensions = array<i32: 1>} : vector<1x128xi32>
    %c8_i32 = arith.constant 8 : i32
    %35 = vector.broadcast %c8_i32 : i32 to vector<1x128xi32>
    %36 = arith.cmpi eq, %34, %35 : vector<1x128xi32>
    %cst_13 = arith.constant 0.000000e+00 : f32
    %37 = vector.broadcast %9 : f32 to vector<1x128xf32>
    %38 = vector.broadcast %cst_13 : f32 to vector<1x128xf32>
    %39 = arith.select %36, %37, %38 : vector<1x128xi1>, vector<1x128xf32>
    %40 = arith.addf %33, %39 : vector<1x128xf32>
    %c9_i32 = arith.constant 9 : i32
    %41 = vector.broadcast %c9_i32 : i32 to vector<1x128xi32>
    %42 = arith.cmpi eq, %34, %41 : vector<1x128xi32>
    %cst_14 = arith.constant 0.000000e+00 : f32
    %43 = vector.shape_cast %24 : vector<1x1xf32> to vector<1x1xf32>
    %44 = vector.broadcast %43 : vector<1x1xf32> to vector<1x128xf32>
    %45 = vector.broadcast %cst_14 : f32 to vector<1x128xf32>
    %46 = arith.select %42, %44, %45 : vector<1x128xi1>, vector<1x128xf32>
    %47 = arith.addf %40, %46 : vector<1x128xf32>
    %c0_15 = arith.constant 0 : index
    %c0_16 = arith.constant 0 : index
    %48 = vector.load %arg3[%c0_15, %c0_16] : memref<1x128xf32, #tpu.memory_space<vmem>>, vector<1x128xf32>
    tpu.vector_store %arg3[%c0_15, %c0_16], %47 {strides = array<i32>} : memref<1x128xf32, #tpu.memory_space<vmem>>, vector<1x128xf32>,
    return
  }
}

</mosaic_0001>

<bundles_post_ra>
// kernel: _fused.1
= control target key start
LH: loop header
LB: loop body
LE: loop exit
PB: predicated region body
PF: predicated region fallthrough
CT: control target
= control target key end

     0   :  { %8 = vsyncpa [#allocation3], 0  ;;  %s264_s0 = inlined_call_operand.vmem [shape: f32[1,256], index: 0, kind: input, shape index: {}]   ;;  %s265_s1 = inlined_call_operand.hbm [shape: f32[8,256], index: 1, kind: input, shape index: {}]   ;;  %s266_s2 = inlined_call_operand.hbm [shape: f32[16,128], index: 2, kind: input, shape index: {}]   ;;  %s267_s3 = inlined_call_operand.hbm [shape: f32[1,128], index: 3, kind: output, shape index: {}]  }
   0x1   :  { %9 = vsyncpa [#allocation6], 0 }
   0x2   :  { %10 = vsyncpa [#allocation4], 0  ;;  %s18_s14 = sshll.u32 %s265_s1, 4  ;;  %s225_s15 = smov [#allocation2]   ;;  %s19_s14 = int_to_ptr.hbm [resolvable:$true] %s18_s14 }
   0x3   :  { %s20_s16 = sshll.u32 %s225_s15, 4  ;;  %s28_s19 = sshll.u32 %s266_s2, 4  ;;  %s21_s16 = int_to_ptr.vmem [resolvable:$true] %s20_s16  ;;  %s29_s19 = int_to_ptr.hbm [resolvable:$true] %s28_s19 }
   0x4   :  { %23 = dma.hbm_to_vmem [thread:$0]  %s19_s14, 256, %s21_s16, [#allocation3]  }
   0x5   :  { %s226_s20 = smov [#allocation5]   ;;  %s227_s22 = smov 128  }
   0x6   :  { %s30_s21 = sshll.u32 %s226_s20, 4  ;;  %s228_s23 = smov 8   ;;  %s31_s21 = int_to_ptr.vmem [resolvable:$true] %s30_s21 }
   0x7   :  { %36 = dma.hbm_to_vmem [thread:$0]  %s29_s19, 256, %s31_s21, [#allocation6], %s227_s22, %s227_s22, %s228_s23  }
   0x8   :  { %219 = dma.done.wait [#allocation3], 256  }
   0x9   :  { %220 = vsyncadd [#allocation3], 4294967040 }
   0xa   :  { %221 = dma.done.wait [#allocation6], 256  }
   0xb   :  { %222 = vsyncadd [#allocation6], 4294967040  ;;  %v45_v0 = vld [vmem:[%s264_s0] sm:$0x3]  ;;  %v47_v2 = vld [vmem:[#allocation2 + $0x8] sm:$0xff]  ;;  %vm58_vm0 = vcmask 7168   ;;  %v90_v36 = vlaneseq }
   0xc   :  { %v46_v1 = vld [vmem:[#allocation2] sm:$0xff]  ;;  %v49_v3 = vperm.slane %v45_v0, 0  ;;  %v50_v4 = vperm.slane %v45_v0, 1  ;;  %v69_v8 = vld [vmem:[#allocation5] sm:$0xff]  ;;  %vm74_vm1 = vcmask 523264   ;;  %vm85_vm2 = vcmask 516096  }
   0xd   :  { %v70_v18 = vld [vmem:[#allocation5 + $0x8] sm:$0x1]  ;;  %v71_v21 = vld [vmem:[#allocation5 + $0x9] sm:$0x1]  ;;  %v229_v25 = vmov 0   ;;  %v91_v37 = vshrl.u32 %v90_v36, 7 }
   0xe   :  { %v53_v5 = vmul.f32 %v49_v3, %v46_v1  ;;  %v54_v6 = vmul.f32 %v50_v4, %v47_v2  ;;  %145 = vset.pattern.permute.xlu1 %v229_v25  ;;  %146 = vset.pattern.permute.xlu0 %v229_v25  ;;  %v72_v33 = vld [vmem:[#allocation5 + $0xa] sm:$0x1]  ;;  %v93_v38 = vand.u32 127, %v90_v36  ;;  %v230_v39 = vmov 0.0   ;;  %s231_s2 = smov [#allocation7]   ;;  %s124_s28 = sshll.u32 %s267_s3, 4  ;;  %s125_s28 = int_to_ptr.hbm [resolvable:$true] %s124_s28 }
   0xf   :  { %s122_s25 = sshll.u32 %s231_s2, 4  ;;  %s123_s25 = int_to_ptr.vmem [resolvable:$true] %s122_s25 }
  0x10   :  { %v55_v7 = vadd.f32 %v54_v6, %v53_v5  ;;  %vm94_vm3 = vcmp.eq.s32.totalorder %v91_v37, %v93_v38  ;;  %vm104_vm4 = vcmp.eq.s32.totalorder %v93_v38, 8  ;;  %vm108_vm5 = vcmp.eq.s32.totalorder %v93_v38, 9 }
  0x11   :  { %v135_v40 = vsel %vm94_vm3, 1.0, %v230_v39 }
  0x12   :  { %56 = vadd.xlane.f32.xlu0 %v55_v7 }
  0x85   :  { %v57_v9 = vpop.xlane.xlu0 %56 }
  0x86   :  { %v73_v10 = vmul.f32 %v69_v8, %v57_v9  ;;  %v59_v11 = vsel %vm58_vm0, %v57_v9, 0.0  ;;  %v97_v41 = vmul.f32 %v135_v40, %v57_v9 }
  0x87   :  { %60 = vadd.xlane.f32.xlu0 %v59_v11 }
  0x88   :  { %v75_v12 = vsel %vm74_vm1, %v73_v10, 0.0  ;;  %v98_v42 = vrot.slane %v97_v41, 4 }
  0x89   :  { %v76_v13 = vrot.slane %v75_v12, 4 }
  0x8a   :  { %v99_v43 = vadd.f32 %v98_v42, %v97_v41 }
  0x8b   :  { %v77_v14 = vadd.f32 %v76_v13, %v75_v12 }
  0x8c   :  { %v100_v44 = vrot.slane %v99_v43, 2 }
  0x8d   :  { %v78_v15 = vrot.slane %v77_v14, 2 }
  0x8e   :  { %v101_v45 = vadd.f32 %v100_v44, %v99_v43 }
  0x8f   :  { %v79_v16 = vadd.f32 %v78_v15, %v77_v14 }
  0x90   :  { %v102_v46 = vrot.slane %v101_v45, 1 }
  0x91   :  { %v80_v17 = vrot.slane %v79_v16, 1 }
  0x92   :  { %v103_v49 = vadd.f32 %v102_v46, %v101_v45 }
  0x93   :  { %v81_v19 = vadd.f32 %v80_v17, %v79_v16 }
  0x95   :  { %v82_v20 = vadd.f32 %v81_v19, %v70_v18 }
  0x97   :  { %v83_v22 = vmax.f32 %v82_v20, 0.0 }
  0x99   :  { %v84_v23 = vmul.f32 %v83_v22, %v71_v21 }
  0x9b   :  { %v86_v24 = vsel %vm85_vm2, %v84_v23, 0.0 }
  0x9c   :  { %87 = vadd.xlane.f32.xlu1 %v86_v24 }
  0xfa   :  { %v61_v26 = vpop.xlane.xlu0 %60 }
  0xfb   :  { %v62_v27 = vrot.slane %v61_v26, 4 }
  0xfd   :  { %v63_v28 = vadd.f32 %v62_v27, %v61_v26 }
  0xff   :  { %v64_v29 = vrot.slane %v63_v28, 2 }
 0x101   :  { %v65_v30 = vadd.f32 %v64_v29, %v63_v28 }
 0x103   :  { %v66_v31 = vrot.slane %v65_v30, 1 }
 0x105   :  { %v67_v32 = vadd.f32 %v66_v31, %v65_v30 }
 0x107   :  { %136 = vpush %v67_v32 }
 0x10f   :  { %v88_v34 = vpop.xlane.xlu1 %87 }
 0x110   :  { %v89_v35 = vadd.f32 %v88_v34, %v72_v33 }
 0x112   :  { %111 = vperm.xlu1 %145, %v89_v35  }
 0x138   :  { %s137_s0 = spop %136 }
 0x139   :  { %v105_v47 = vstv %s137_s0 }
 0x13a   :  { %v106_v48 = vsel %vm104_vm4, %v105_v47, 0.0 }
 0x13b   :  { %v107_v50 = vadd.f32 %v106_v48, %v103_v49 }
 0x184   :  { %v112_v51 = vpop.permute.xlu1 %111 }
 0x185   :  { %v114_v52 = vsel %vm108_vm5, %v112_v51, 0.0 }
 0x186   :  { %v115_v53 = vadd.f32 %v114_v52, %v107_v50 }
 0x188   :  { %116 = vst [vmem:[#allocation7] sm:$0x1] %v115_v53 }
 0x189   :  { %127 = dma.vmem_to_hbm [thread:$0]  %s123_s25, 16, %s125_s28, [#allocation4]  }
 0x18a   :  { %223 = dma.done.wait [#allocation4], 16  }
 0x18b   :  { %224 = vsyncadd [#allocation4], 4294967280 }
 0x18c   :  { %132 = vsyncpa [#allocation3], 1 }
 0x18d   :  { %133 = vsyncpa [#allocation6], 1 }
 0x18e   :  { %134 = vsyncpa [#allocation4], 1 }

</bundles_post_ra>
